<compile_context>
chip_gen: v7x
topology: tpu7x:2x2x1
jax: 0.10.0
libtpu: 0.0.40
codegen_flags: <defaults>
</compile_context>

<pallas_src>
import functools

import jax
import jax.numpy as jnp
from jax import lax
from jax.experimental import pallas as pl
from jax.experimental.pallas import tpu as pltpu


def _round_up(n, m):
    return (n + m - 1) // m * m


def _vmem_capacity_bytes():
    """Physical VMEM of the current TPU; conservative 64 MiB (v7x) fallback."""
    try:
        info = pltpu.get_tpu_info()
        cap = getattr(info, "vmem_capacity_bytes", None)
        if cap:
            return int(cap)
    except Exception:
        pass
    return 64 * 1024 * 1024


def _choose_block_batch(B, per_sample_bytes, block_budget_bytes):
    """Largest divisor of B that fits the budget, keeping >=2 grid steps when B>=2.

    Returns None if even a single sample does not fit (caller uses the
    two-phase fallback)."""
    divisors = [d for d in range(1, B + 1) if B % d == 0]
    fitting = [d for d in divisors if d * per_sample_bytes <= block_budget_bytes]
    if not fitting:
        return None
    if B >= 2:
        multi_step = [d for d in fitting if B // d >= 2]
        if multi_step:
            return max(multi_step)
    return max(fitting)


# ---------------------------------------------------------------------------
# Fused single-pass path: one grid step handles (Bt, C, HW).
# ---------------------------------------------------------------------------

def _fused_kernel(x_ref, w1t_ref, w2t_ref, o_ref):
    xb = x_ref[...]                                               # (Bt, C, HW), native dtype
    hw = xb.shape[-1]

    # Global pooling over the lane (spatial) axis; f32 accumulation for the sum.
    avg = jnp.sum(xb, axis=-1, dtype=jnp.float32) * (1.0 / hw)    # (Bt, C)
    mx = jnp.max(xb, axis=-1).astype(jnp.float32)                 # (Bt, C)

    w1t = w1t_ref[...].astype(jnp.float32)                        # (C, C_red)
    w2t = w2t_ref[...].astype(jnp.float32)                        # (C_red, C)

    # fc(avg)+fc(mx) == (relu(avg@W1t) + relu(mx@W1t)) @ W2t   (second conv is linear)
    ha = jnp.maximum(jnp.dot(avg, w1t, preferred_element_type=jnp.float32), 0.0)
    hm = jnp.maximum(jnp.dot(mx, w1t, preferred_element_type=jnp.float32), 0.0)
    attn = jax.nn.sigmoid(jnp.dot(ha + hm, w2t, preferred_element_type=jnp.float32))

    # Scale the native-dtype block directly (no full-block f32 temp).
    o_ref[...] = (xb * attn.astype(xb.dtype)[:, :, None]).astype(o_ref.dtype)


def _fused_path(x_flat, w1t, w2t, Bt, vmem_limit):
    B, C, HW = x_flat.shape
    C_red = w1t.shape[1]
    itemsize = jnp.dtype(x_flat.dtype).itemsize

    cost = pl.CostEstimate(
        flops=B * (6 * C * C_red + 3 * C * HW),
        transcendentals=B * C,
        bytes_accessed=2 * B * C * HW * itemsize + int(w1t.size + w2t.size) * 4,
    )

    return pl.pallas_call(
        _fused_kernel,
        out_shape=jax.ShapeDtypeStruct((B, C, HW), x_flat.dtype),
        grid_spec=pltpu.PrefetchScalarGridSpec(
            num_scalar_prefetch=0,
            grid=(B // Bt,),
            in_specs=[
                pl.BlockSpec((Bt, C, HW), lambda b: (b, 0, 0)),
                pl.BlockSpec((C, C_red), lambda b: (0, 0)),
                pl.BlockSpec((C_red, C), lambda b: (0, 0)),
            ],
            out_specs=pl.BlockSpec((Bt, C, HW), lambda b: (b, 0, 0)),
        ),
        compiler_params=pltpu.CompilerParams(
            dimension_semantics=("parallel",),
            vmem_limit_bytes=vmem_limit,
        ),
        cost_estimate=cost,
    )(x_flat, w1t, w2t)


# ---------------------------------------------------------------------------
# Two-phase fallback: (1) HW-tiled pooling + FC  ->  attention (B,1,C)
#                     (2) HW-tiled scale of x by attention
# Engages only when a single sample's (C, HW) block exceeds the VMEM budget.
# ---------------------------------------------------------------------------

def _pool_fc_kernel(x_ref, w1t_ref, w2t_ref, attn_ref, sum_sc, max_sc, *, hw_true, hw_tile):
    h = pl.program_id(1)

    @pl.when(h == 0)
    def _():
        sum_sc[...] = jnp.zeros_like(sum_sc)
        max_sc[...] = jnp.full_like(max_sc, -jnp.inf)

    xb = x_ref[...]                                               # (1, C, hw_tile)
    if hw_true % hw_tile != 0:
        lane = lax.broadcasted_iota(jnp.int32, xb.shape, 2) + h * hw_tile
        valid = lane < hw_true
        xsum_src = jnp.where(valid, xb, 0.0)
        xmax_src = jnp.where(valid, xb, -jnp.inf)
    else:
        xsum_src = xb
        xmax_src = xb

    sum_sc[...] += jnp.sum(xsum_src, axis=-1, dtype=jnp.float32)          # (1, C)
    max_sc[...] = jnp.maximum(max_sc[...], jnp.max(xmax_src, axis=-1).astype(jnp.float32))

    @pl.when(h == pl.num_programs(1) - 1)
    def _():
        avg = sum_sc[...] * (1.0 / hw_true)                       # (1, C)
        mx = max_sc[...]
        w1t = w1t_ref[...].astype(jnp.float32)
        w2t = w2t_ref[...].astype(jnp.float32)
        ha = jnp.maximum(jnp.dot(avg, w1t, preferred_element_type=jnp.float32), 0.0)
        hm = jnp.maximum(jnp.dot(mx, w1t, preferred_element_type=jnp.float32), 0.0)
        attn = jax.nn.sigmoid(jnp.dot(ha + hm, w2t, preferred_element_type=jnp.float32))
        attn_ref[...] = attn[:, None, :].astype(attn_ref.dtype)   # (1, 1, C)


def _scale_kernel(x_ref, attn_ref, o_ref):
    xb = x_ref[...]                                               # (1, C, hw_tile)
    a = attn_ref[...].astype(xb.dtype)                            # (1, C, 1)
    o_ref[...] = (xb * a).astype(o_ref.dtype)


def _two_phase_path(x_flat, w1t, w2t, vmem_limit, block_budget):
    B, C, HW = x_flat.shape
    C_red = w1t.shape[1]
    itemsize = jnp.dtype(x_flat.dtype).itemsize

    # Pick an HW tile (multiple of 128) that fits the per-block budget.
    # TODO(synk): if C alone is so large that (1, C, 128) overflows VMEM, the C
    # axis would also need tiling; not needed for realistic CNN channel counts.
    col_bytes = max(1, C * 128 * itemsize)
    hw_tile = max(128, (block_budget // col_bytes) * 128)
    hw_tile = min(hw_tile, _round_up(HW, 128))
    n_hw = pl.cdiv(HW, hw_tile)

    # Phase 1: pooling + FC -> attention weights (B, 1, C).
    attn = pl.pallas_call(
        functools.partial(_pool_fc_kernel, hw_true=HW, hw_tile=hw_tile),
        out_shape=jax.ShapeDtypeStruct((B, 1, C), jnp.float32),
        grid_spec=pltpu.PrefetchScalarGridSpec(
            num_scalar_prefetch=0,
            grid=(B, n_hw),
            in_specs=[
                pl.BlockSpec((1, C, hw_tile), lambda b, h: (b, 0, h)),
                pl.BlockSpec((C, C_red), lambda b, h: (0, 0)),
                pl.BlockSpec((C_red, C), lambda b, h: (0, 0)),
            ],
            out_specs=pl.BlockSpec((1, 1, C), lambda b, h: (b, 0, 0)),
            scratch_shapes=[pltpu.VMEM((1, C), jnp.float32),
                            pltpu.VMEM((1, C), jnp.float32)],
        ),
        compiler_params=pltpu.CompilerParams(
            dimension_semantics=("parallel", "arbitrary"),
            vmem_limit_bytes=vmem_limit,
        ),
    )(x_flat, w1t, w2t)

    # Tiny (B*C) transpose in XLA so the scale kernel needs no in-kernel relayout.
    attn_col = jnp.transpose(attn, (0, 2, 1))                     # (B, C, 1)

    # Phase 2: scale x by attention, HW tiled (ragged tail writes are dropped).
    out = pl.pallas_call(
        _scale_kernel,
        out_shape=jax.ShapeDtypeStruct((B, C, HW), x_flat.dtype),
        grid_spec=pltpu.PrefetchScalarGridSpec(
            num_scalar_prefetch=0,
            grid=(B, n_hw),
            in_specs=[
                pl.BlockSpec((1, C, hw_tile), lambda b, h: (b, 0, h)),
                pl.BlockSpec((1, C, 1), lambda b, h: (b, 0, 0)),
            ],
            out_specs=pl.BlockSpec((1, C, hw_tile), lambda b, h: (b, 0, h)),
        ),
        compiler_params=pltpu.CompilerParams(
            dimension_semantics=("parallel", "parallel"),
            vmem_limit_bytes=vmem_limit,
        ),
    )(x_flat, attn_col)
    return out


# ---------------------------------------------------------------------------
# Public wrapper
# ---------------------------------------------------------------------------

def channel_attention(x, w1, w2, *, force_two_phase=False):
    """x: (B, C, H, W); w1: (C//r, C) first 1x1 conv weight; w2: (C, C//r) second 1x1 conv weight."""
    B, C, H, W = x.shape
    HW = H * W

    x_flat = x.reshape(B, C, HW)
    w1t = jnp.asarray(w1).T                                       # (C, C_red)
    w2t = jnp.asarray(w2).T                                       # (C_red, C)
    itemsize = jnp.dtype(x.dtype).itemsize

    # Generation-aware VMEM plan: limit ~0.8x physical; budget the input block
    # against ~5x (double-buffered input + output + in-kernel temps).
    vmem_cap = _vmem_capacity_bytes()
    vmem_limit = int(vmem_cap * 0.8)
    block_budget = vmem_limit // 5

    per_sample_bytes = C * HW * itemsize
    Bt = None if force_two_phase else _choose_block_batch(B, per_sample_bytes, block_budget)

    if Bt is not None:
        out_flat = _fused_path(x_flat, w1t, w2t, Bt, vmem_limit)
    else:
        out_flat = _two_phase_path(x_flat, w1t, w2t, vmem_limit, block_budget)
    return out_flat.reshape(B, C, H, W)


def reference(x, w1, w2):
    # Pure-JAX reference of the PyTorch forward (for sanity checking).
    avg = jnp.mean(x, axis=(2, 3))                                # (B, C)
    mx = jnp.max(x, axis=(2, 3))                                  # (B, C)

    def fc(v):                                                    # (B, C)
        h = jnp.maximum(v @ w1.T, 0.0)                            # (B, C_red)
        return h @ w2.T                                           # (B, C)

    attn = jax.nn.sigmoid(fc(avg) + fc(mx))                       # (B, C)
    return x * attn[:, :, None, None]


if __name__ == "__main__":
    key = jax.random.PRNGKey(0)
    k_main, k_ragged = jax.random.split(key, 2)

    def make_inputs(k, B, C, H, W, r):
        C_red = max(1, C // r)
        kx, k1, k2 = jax.random.split(k, 3)
        x = jax.random.normal(kx, (B, C, H, W), dtype=jnp.float32)
        # Conv2d(C, C_red, 1, bias=False) weight -> (C_red, C, 1, 1) flattened to (C_red, C)
        w1 = jax.random.normal(k1, (C_red, C), dtype=jnp.float32) * (1.0 / jnp.sqrt(C))
        # Conv2d(C_red, C, 1, bias=False) weight -> (C, C_red, 1, 1) flattened to (C, C_red)
        w2 = jax.random.normal(k2, (C, C_red), dtype=jnp.float32) * (1.0 / jnp.sqrt(C_red))
        return x, w1, w2

    # 1) Main fused path (B=2, C=32, 16x16).
    x, w1, w2 = make_inputs(k_main, 2, 32, 16, 16, 8)
    out = jax.block_until_ready(channel_attention(x, w1, w2))
    ref = reference(x, w1, w2)
    assert jnp.allclose(out, ref, atol=1e-5, rtol=1e-5), "fused path mismatch"

    # 2) Ragged spatial extent (HW = 25, not a multiple of 128) -> no pad, no slice.
    x2, w1b, w2b = make_inputs(k_ragged, 2, 16, 5, 5, 4)
    out2 = jax.block_until_ready(channel_attention(x2, w1b, w2b))
    ref2 = reference(x2, w1b, w2b)
    assert jnp.allclose(out2, ref2, atol=1e-5, rtol=1e-5), "ragged fused path mismatch"

    # 3) Two-phase fallback path, exercised explicitly (both even and ragged HW).
    out3 = jax.block_until_ready(channel_attention(x, w1, w2, force_two_phase=True))
    assert jnp.allclose(out3, ref, atol=1e-5, rtol=1e-5), "two-phase path mismatch"
    out4 = jax.block_until_ready(channel_attention(x2, w1b, w2b, force_two_phase=True))
    assert jnp.allclose(out4, ref2, atol=1e-5, rtol=1e-5), "ragged two-phase path mismatch"

    print("KERNEL_OK")
</pallas_src>

<mosaic_0001>
module attributes {stable_mosaic.version = 11 : i64} {
  func.func @_fused_kernel(%arg0: i32, %arg1: memref<1x32x256xf32, #tpu.memory_space<vmem>>, %arg2: memref<32x4xf32, #tpu.memory_space<vmem>>, %arg3: memref<4x32xf32, #tpu.memory_space<vmem>>, %arg4: memref<1x32x256xf32, #tpu.memory_space<vmem>>) attributes {dimension_semantics = [#tpu.dimension_semantics<parallel>], iteration_bounds = array<i64: 2>, scalar_prefetch = 0 : i64, scratch_operands = 0 : i64, tpu.core_type = #tpu.core_type<tc>, window_params = [{transform_indices = @transform_0, window_bounds = array<i64: 1, 32, 256>}, {pipeline_mode = #tpu.pipeline_mode<synchronous>, transform_indices = @transform_1, window_bounds = array<i64: 32, 4>}, {pipeline_mode = #tpu.pipeline_mode<synchronous>, transform_indices = @transform_2, window_bounds = array<i64: 4, 32>}, {transform_indices = @transform_3, window_bounds = array<i64: 1, 32, 256>}]} {
    %c0 = arith.constant 0 : index
    %c0_0 = arith.constant 0 : index
    %c0_1 = arith.constant 0 : index
    %0 = vector.load %arg1[%c0, %c0_0, %c0_1] : memref<1x32x256xf32, #tpu.memory_space<vmem>>, vector<1x32x256xf32>
    %cst = arith.constant dense<0.000000e+00> : vector<1x32xf32>
    %1 = vector.multi_reduction <add>, %0, %cst [2] : vector<1x32x256xf32> to vector<1x32xf32>
    %cst_2 = arith.constant 3.906250e-03 : f32
    %2 = vector.broadcast %cst_2 : f32 to vector<1x32xf32>
    %3 = arith.mulf %1, %2 : vector<1x32xf32>
    %cst_3 = arith.constant dense<0xFF800000> : vector<1x32xf32>
    %4 = vector.multi_reduction <maximumf>, %0, %cst_3 [2] : vector<1x32x256xf32> to vector<1x32xf32>
    %c0_4 = arith.constant 0 : index
    %c0_5 = arith.constant 0 : index
    %5 = vector.load %arg2[%c0_4, %c0_5] : memref<32x4xf32, #tpu.memory_space<vmem>>, vector<32x4xf32>
    %c0_6 = arith.constant 0 : index
    %c0_7 = arith.constant 0 : index
    %6 = vector.load %arg3[%c0_6, %c0_7] : memref<4x32xf32, #tpu.memory_space<vmem>>, vector<4x32xf32>
    %cst_8 = arith.constant dense<0.000000e+00> : vector<1x4xf32>
    %7 = tpu.matmul %3, %5, %cst_8 {dimension_numbers = #tpu.dot_dimension_numbers<[1], [0], [0], [1], [0, 0, 1, 1], [], []>} : vector<1x32xf32>, vector<32x4xf32>, vector<1x4xf32> -> vector<1x4xf32>
    %cst_9 = arith.constant 0.000000e+00 : f32
    %8 = vector.broadcast %cst_9 : f32 to vector<1x4xf32>
    %9 = arith.maximumf %7, %8 : vector<1x4xf32>
    %cst_10 = arith.constant dense<0.000000e+00> : vector<1x4xf32>
    %10 = tpu.matmul %4, %5, %cst_10 {dimension_numbers = #tpu.dot_dimension_numbers<[1], [0], [0], [1], [0, 0, 1, 1], [], []>} : vector<1x32xf32>, vector<32x4xf32>, vector<1x4xf32> -> vector<1x4xf32>
    %cst_11 = arith.constant 0.000000e+00 : f32
    %11 = vector.broadcast %cst_11 : f32 to vector<1x4xf32>
    %12 = arith.maximumf %10, %11 : vector<1x4xf32>
    %13 = arith.addf %9, %12 : vector<1x4xf32>
    %cst_12 = arith.constant dense<0.000000e+00> : vector<1x32xf32>
    %14 = tpu.matmul %13, %6, %cst_12 {dimension_numbers = #tpu.dot_dimension_numbers<[1], [0], [0], [1], [0, 0, 1, 1], [], []>} : vector<1x4xf32>, vector<4x32xf32>, vector<1x32xf32> -> vector<1x32xf32>
    %15 = arith.negf %14 : vector<1x32xf32>
    %16 = math.exp %15 : vector<1x32xf32>
    %cst_13 = arith.constant 1.000000e+00 : f32
    %17 = vector.broadcast %cst_13 : f32 to vector<1x32xf32>
    %18 = arith.addf %17, %16 : vector<1x32xf32>
    %19 = arith.divf %17, %18 : vector<1x32xf32>
    %20 = vector.shape_cast %19 : vector<1x32xf32> to vector<1x32x1xf32>
    %21 = vector.broadcast %20 : vector<1x32x1xf32> to vector<1x32x256xf32>
    %22 = arith.mulf %0, %21 : vector<1x32x256xf32>
    %c0_14 = arith.constant 0 : index
    %c0_15 = arith.constant 0 : index
    %c0_16 = arith.constant 0 : index
    %23 = vector.load %arg4[%c0_14, %c0_15, %c0_16] : memref<1x32x256xf32, #tpu.memory_space<vmem>>, vector<1x32x256xf32>
    tpu.vector_store %arg4[%c0_14, %c0_15, %c0_16], %22 {strides = array<i32>} : memref<1x32x256xf32, #tpu.memory_space<vmem>>, vector<1x32x256xf32>,
    return
  }
  func.func @transform_0(%arg0: i32) -> (i32, i32, i32) {
    %c0_i32 = arith.constant 0 : i32
    %c0_i32_0 = arith.constant 0 : i32
    %c0_i32_1 = arith.constant 0 : i32
    return %arg0, %c0_i32, %c0_i32_0 : i32, i32, i32
  }
  func.func @transform_1(%arg0: i32) -> (i32, i32) {
    %c0_i32 = arith.constant 0 : i32
    %c0_i32_0 = arith.constant 0 : i32
    %c0_i32_1 = arith.constant 0 : i32
    return %c0_i32, %c0_i32_0 : i32, i32
  }
  func.func @transform_2(%arg0: i32) -> (i32, i32) {
    %c0_i32 = arith.constant 0 : i32
    %c0_i32_0 = arith.constant 0 : i32
    %c0_i32_1 = arith.constant 0 : i32
    return %c0_i32, %c0_i32_0 : i32, i32
  }
  func.func @transform_3(%arg0: i32) -> (i32, i32, i32) {
    %c0_i32 = arith.constant 0 : i32
    %c0_i32_0 = arith.constant 0 : i32
    %c0_i32_1 = arith.constant 0 : i32
    return %arg0, %c0_i32, %c0_i32_0 : i32, i32, i32
  }
}

</mosaic_0001>

<bundles_post_ra>
// kernel: tpu_custom_call.1
= control target key start
LH: loop header
LB: loop body
LE: loop exit
PB: predicated region body
PF: predicated region fallthrough
CT: control target
= control target key end

     0   :  { %8 = vsyncpa [#allocation3], 0  ;;  %s1129_s0 = inlined_call_operand.hbm [shape: f32[2,32,256], index: 0, kind: input, shape index: {}]   ;;  %s1130_s1 = inlined_call_operand.vmem [shape: f32[32,4], index: 1, kind: input, shape index: {}]   ;;  %s1131_s2 = inlined_call_operand.vmem [shape: f32[4,32], index: 2, kind: input, shape index: {}]   ;;  %s1132_s3 = inlined_call_operand.hbm [shape: f32[2,32,256], index: 3, kind: output, shape index: {}]  }
   0x1   :  { %10 = vsyncpa [#allocation3 + $0x1], 0 }
   0x2   :  { %11 = vsyncpa [#allocation4], 0 }
   0x3   :  { %13 = vsyncpa [#allocation4 + $0x1], 0  ;;  %s894_s12 = smov 0   ;;  %s896_s13 = smov 0  }
   0x4   :  { %s898_s14 = smov 0   ;;  %s900_s15 = smov 0  }
   0x5 LB: > { %s915_s16 = sadd.s32 4294967295, %s863_s15   ;;  %s638_s17 = sadd.s32 4294967294, %s863_s15   ;;  %s863_s15 = sphi %s900_s15, %s1145_s15   ;;  %s859_s14 = sphi %s898_s14, %s1144_s14   ;;  %s855_s13 = sphi %s896_s13, %s1143_s13   ;;  %s851_s12 = sphi %s894_s12, %s1142_s12  }
   0x6   : > { %s919_s18 = sadd.s32 1, %s863_s15   ;;  %s26_s19 = sadd.s32 1, %s859_s14 }
   0x7   : > { %s23_s20 = ssub.s32 %s863_s15, %s919_s18  ;;  %p33_p0 = scmp.ne.s32.totalorder %s859_s14, %s855_s13 }
   0x8   : > { %p24_p1 = scmp.eq.s32.totalorder %s23_s20, 0  ;;  %p34_p2 = scmp.eq.s32.totalorder %s863_s15, 0 }
   0x9   : > { %p39_p3 = scmp.ne.s32.totalorder %s855_s13, %s851_s12  ;;  %p40_p4 = scmp.eq.s32.totalorder %s915_s16, 0 }
   0xa   : > { %s931_s21 = scalar_select %p24_p1, %s859_s14, %s26_s19  }
   0xb   : > { %p933_p5 = por %p34_p2, %p33_p0  ;;  %p937_p6 = por %p40_p4, %p39_p3 }
   0xc   : > { %p105_p7 = scmp.eq.s32.totalorder %s915_s16, 1  ;;  %p111_p8 = scmp.eq.s32.totalorder %s638_s17, 1 }
   0xd   : > { %p722_p10 = scmp.lt.s32.totalorder %s863_s15, 2  ;;  %s137_s26 = sand.u32 1, %s859_s14  }
   0xe   : > { %p944_p11 = por %p105_p7, %p33_p0  ;;  %p948_p12 = por %p111_p8, %p39_p3 }
   0xf   : > { %s657_s27 = sshll.u32 %s863_s15, 10  ;;  %s641_s28 = sshll.u32 %s137_s26, 6 }
  0x10   : > { %s1136_s24 = scalar_select %p944_p11, 1, 0 }
  0x11   : > { %s1137_s25 = scalar_select %p948_p12, 1, 0 }
  0x12   : > { %s957_s4 = scalar_lea.hbm %s1129_s0, %s657_s27  ;;  %s141_s5 = scalar_lea.vmem [#allocation2], %s641_s28 }
  0x13   : > { %s148_s6 = sshll.u32 %s141_s5, 4  ;;  %p961_p13 = pnand %p722_p10, %p933_p5  ;;  %s965_s6 = int_to_ptr.vmem [resolvable:$true] %s148_s6 }
  0x14   : > { %s967_s8 = scalar_lea.sflag [#allocation3], %s137_s26  ;;  %s767_s9 = scalar_lea.hbm %s957_s4, 1024 }
  0x15   : > { %p768_p0 = scmp.ne.s32.totalorder %s957_s4, %s767_s9  ;;  %p769_p1 = pneg %p961_p13 }
  0x16   : > { %s772_s17 = scalar_lea.hbm %s1129_s0, 2048  ;;  %p773_p4 = scmp.lt.u32.totalorder %s957_s4, %s1129_s0 }
  0x17   : > { %p770_p2 = pnand %p769_p1, %p768_p0  ;;  %p774_p5 = scmp.lt.u32.totalorder %s772_s17, %s767_s9 }
  0x18   : > { %p776_p8 = scmp.lt.u32.totalorder %s767_s9, %s957_s4 }
  0x19   : > { %p771_p3 = pneg %p770_p2  ;;  %p775_p7 = por %p774_p5, %p773_p4 }
  0x1b   : > { %p777_p10 = por %p776_p8, %p775_p7 }
  0x1d   : > { %p778_p9 = pnand %p777_p10, %p771_p3 }
  0x1f   : > { %781 = shalt.err (!%p778_p9)
}
  0x20   : > { %s782_s22 = scalar_lea.vmem %s965_s6, 1024  ;;  %s865_s26 = smov [#allocation2]  }
  0x21   : > { %p783_p0 = scmp.ne.s32.totalorder %s965_s6, %s782_s22  ;;  %s787_s27 = sshll.u32 %s865_s26, 4  ;;  %s788_s27 = int_to_ptr.vmem [resolvable:$false] %s787_s27 }
  0x22   : > { %s789_s28 = scalar_lea.vmem %s788_s27, 2048  ;;  %p790_p11 = scmp.lt.s32.totalorder %s965_s6, %s788_s27 }
  0x23   : > { %p785_p2 = pnand %p783_p0, %p769_p1  ;;  %p791_p4 = scmp.lt.s32.totalorder %s789_s28, %s782_s22 }
  0x25   : > { %p786_p12 = pneg %p785_p2  ;;  %p792_p5 = por %p791_p4, %p790_p11 }
  0x27   : > { %p793_p7 = pnand %p792_p5, %p786_p12 }
  0x29   : > { %796 = shalt.err (!%p793_p7)
}
  0x2a   : > { %s866_s29 = smov 256   ;;  %s867_s30 = smov 16  }
  0x2b   : > { %717 = dma.hbm_to_vmem [thread:$0]  (!%p961_p13), %s957_s4, 1024, %s965_s6, %s967_s8, %s866_s29, %s866_s29, %s867_s30  }
  0x2c   : > { %p644_p9 = scmp.ge.s32.totalorder %s863_s15, 1  ;;  %p156_p1 = scmp.lt.s32.totalorder %s863_s15, 3 }
  0x2e   : > { %p157_p3 = pnand %p644_p9, %p156_p1 }
  0x2f   : > { %s998_s5 = sand.u32 (!%p157_p3), 1, %s855_s13  }
  0x30   : > { %160 = sbr.rel (%p157_p3) target bundleno = 814 (0x32e), region = 32  ;;  %s645_s9 = sshll.u32 (!%p157_p3), %s998_s5, 6 }
  0x31   : > { %s163_s10 = scalar_lea.sflag (!%p157_p3), [#allocation3], %s998_s5  ;;  %s166_s11 = scalar_lea.vmem (!%p157_p3), [#allocation2], %s645_s9 }
  0x37   : > { %842 = dma.done.wait (%p937_p6), %s163_s10, 1024  }
  0x38   : > { %844 = vsyncadd (%p937_p6), %s163_s10, 4294966272  ;;  %v1008_v0 = vld [vmem:[%s166_s11 + $0x20] sm:$0xff]  ;;  %v1010_v1 = vld [vmem:[%s166_s11 + $0x28] sm:$0xff]  ;;  %v868_v19 = vmov 0.0|0.0   ;;  %vm869_vm0 = vmmov 0   ;;  %v870_v23 = vmov 0.0   ;;  %v234_v24 = vlaneseq }
  0x39   : > { %v1012_v2 = vld [vmem:[%s166_s11] sm:$0xff]  ;;  %v203_v3 = vadd.f32 %v1010_v1, %v1008_v0  ;;  %v1016_v4 = vld [vmem:[%s166_s11 + $0x8] sm:$0xff]  ;;  %v1018_v5 = vld [vmem:[%s166_s11 + $0x30] sm:$0xff]  ;;  %v219_v15 = vmax.f32 %v1008_v0, %v1010_v1  ;;  %698 = vmatprep.subr.bf16.mxu0 %v868_v19  ;;  %704 = vmatprep.subr.bf16.mxu1 %v868_v19  ;;  %vm245_vm1 = vcmask 130112   ;;  %vm252_vm2 = vcmask 195712   ;;  %s188_s27 = scalar_lea.vmem [#allocation5], %s645_s9 }
  0x3a   : > { %v1020_v6 = vld [vmem:[%s166_s11 + $0x38] sm:$0xff]  ;;  %v197_v7 = vadd.f32 %v1016_v4, %v1012_v2  ;;  %v1024_v8 = vld [vmem:[%s166_s11 + $0x10] sm:$0xff]  ;;  %v213_v13 = vmax.f32 %v1012_v2, %v1016_v4  ;;  %v225_v16 = vld [vmem:[%s1130_s1] sm:$0xff]  ;;  %679 = vmatprep.mubr.msk.f32.mxu0 %vm869_vm0, %v870_v23  ;;  %690 = vmatprep.mubr.msk.f32.mxu1 %vm869_vm0, %v870_v23  ;;  %v235_v25 = vand.u32 127, %v234_v24  ;;  %v1054_v26 = vshrl.u32 %v234_v24, 7  ;;  %s565_s28 = sshll.u32 %s188_s27, 4  ;;  %s1078_s28 = int_to_ptr.vmem [resolvable:$true] %s565_s28 }
  0x3b   : > { %v1026_v9 = vld [vmem:[%s166_s11 + $0x18] sm:$0xff]  ;;  %204 = vadd.xlane.f32.xlu1 %v203_v3  ;;  %v206_v10 = vadd.f32 %v1020_v6, %v1018_v5  ;;  %v222_v14 = vmax.f32 %v1018_v5, %v1020_v6  ;;  %v226_v17 = vld [vmem:[%s1130_s1 + $0x8] sm:$0xff]  ;;  %v227_v20 = vld [vmem:[%s1130_s1 + $0x10] sm:$0xff]  ;;  %vm259_vm3 = vcmask 261312   ;;  %vm261_vm4 = vcmask 261120   ;;  %s658_s29 = sshll.u32 %s915_s16, 10 }
  0x3c   : > { %198 = vadd.xlane.f32.xlu0 %v197_v7  ;;  %v200_v11 = vadd.f32 %v1026_v9, %v1024_v8  ;;  %v216_v12 = vmax.f32 %v1024_v8, %v1026_v9  ;;  %v699_v18 = vpack.c.bf16 %v226_v17, %v225_v16  ;;  %v228_v21 = vld [vmem:[%s1130_s1 + $0x18] sm:$0xff]  ;;  %v254_v28 = vadd.s32 4294967272, %v235_v25  ;;  %v229_v60 = vld [vmem:[%s1131_s2] sm:$0xf]  ;;  %s1083_s10 = scalar_lea.hbm %s1132_s3, %s658_s29  ;;  %s552_s16 = scalar_lea.sflag [#allocation4], %s998_s5 }
  0x3d   : > { %v702_v22 = vpack.c.bf16 %v228_v21, %v227_v20  ;;  %v240_v29 = vadd.s32 4294967288, %v235_v25  ;;  %v247_v30 = vadd.s32 4294967280, %v235_v25  ;;  %v238_v32 = vsub.s32 %v235_v25, %v1054_v26  ;;  %s797_s11 = scalar_lea.vmem %s1078_s28, 1024  ;;  %p1139_p11 = scmp.ne.s32.totalorder %s1136_s24, 0 }
  0x3e   : > { %700 = vmatpush3.bf16.msra.mxu0 %v699_v18  ;;  %706 = vmatpush3.bf16.msra.mxu1 %v699_v18  ;;  %v257_v34 = vsub.s32 %v254_v28, %v1054_v26  ;;  %vm436_vm5 = vcmask 1043456   ;;  %vm432_vm6 = vcmask 31744   ;;  %v518_v17 = vsub.s32 0, %v1054_v26  ;;  %p798_p6 = scmp.ne.s32.totalorder %s1078_s28, %s797_s11  ;;  %s871_s23 = smov [#allocation5]  }
  0x3f   : > { %207 = vadd.xlane.f32.xlu1 %v206_v10  ;;  %701 = vmatprep.subr.bf16.mxu0 %v868_v19  ;;  %v243_v36 = vsub.s32 %v240_v29, %v1054_v26  ;;  %v250_v37 = vsub.s32 %v247_v30, %v1054_v26  ;;  %s801_s4 = sshll.u32 %s871_s23, 4  ;;  %s802_s4 = int_to_ptr.vmem [resolvable:$false] %s801_s4 }
  0x40   : > { %201 = vadd.xlane.f32.xlu0 %v200_v11  ;;  %707 = vmatprep.subr.bf16.mxu1 %v868_v19  ;;  %p799_p12 = pnand %p798_p6, %p1139_p11  ;;  %s803_s6 = scalar_lea.vmem %s802_s4, 2048 }
  0x41   : > { %p804_p8 = scmp.lt.s32.totalorder %s1078_s28, %s802_s4  ;;  %p805_p10 = scmp.lt.s32.totalorder %s803_s6, %s797_s11 }
  0x42   : > { %703 = vmatpush3.bf16.msra.mxu0 %v702_v22  ;;  %709 = vmatpush3.bf16.msra.mxu1 %v702_v22  ;;  %p800_p13 = pneg %p799_p12 }
  0x43   : > { %217 = vmax.xlane.f32.xlu1 %v216_v12  ;;  %693 = vmatprep.subr.mxu0 %v870_v23  ;;  %p806_p0 = por %p805_p10, %p804_p8 }
  0x44   : > { %214 = vmax.xlane.f32.xlu0 %v213_v13 }
  0x45   : > { %p807_p2 = pnand %p806_p0, %p800_p13 }
  0x47   : > { %223 = vmax.xlane.f32.xlu1 %v222_v14 }
  0x48   : > { %220 = vmax.xlane.f32.xlu0 %v219_v15 }
  0xc8   : > { %v205_v27 = vpop.xlane.xlu1 %204 }
  0xc9   : > { %v199_v31 = vpop.xlane.xlu0 %198  ;;  %v211_v38 = vmul.f32 0.00390625, %v205_v27 }
  0xca   : > { %v209_v33 = vmul.f32 0.00390625, %v199_v31 }
  0xcb   : > { %v251_v46 = vrot.slane %v211_v38, %v250_v37 }
  0xcc   : > { %v208_v35 = vpop.xlane.xlu1 %207  ;;  %v239_v42 = vrot.slane %v209_v33, %v238_v32 }
  0xcd   : > { %v212_v39 = vmul.f32 0.00390625, %v208_v35  ;;  %v202_v40 = vpop.xlane.xlu0 %201 }
  0xce   : > { %v210_v41 = vmul.f32 0.00390625, %v202_v40 }
  0xcf   : > { %v258_v43 = vrot.slane %v212_v39, %v257_v34 }
  0xd0   : > { %v244_v44 = vrot.slane %v210_v41, %v243_v36  ;;  %v218_v45 = vpop.xlane.xlu1 %217 }
  0xd1   : > { %v215_v47 = vpop.xlane.xlu0 %214  ;;  %v346_v49 = vrot.slane %v218_v45, %v243_v36 }
  0xd2   : > { %v246_v48 = vsel %vm245_vm1, %v244_v44, %v239_v42  ;;  %v342_v50 = vrot.slane %v215_v47, %v238_v32 }
  0xd3   : > { %v253_v51 = vsel %vm252_vm2, %v251_v46, %v246_v48 }
  0xd4   : > { %v260_v52 = vsel %vm259_vm3, %v258_v43, %v253_v51  ;;  %v224_v53 = vpop.xlane.xlu1 %223  ;;  %v347_v57 = vsel %vm245_vm1, %v346_v49, %v342_v50 }
  0xd5   : > { %680 = vmatmul.mubr.msk.f32.vlgmr.msra.gmra.mrb[0].mxu0 %vm261_vm4, %v260_v52  ;;  %v221_v54 = vpop.xlane.xlu0 %220  ;;  %v356_v55 = vrot.slane %v224_v53, %v257_v34 }
  0xd6   : > { %v351_v56 = vrot.slane %v221_v54, %v250_v37  ;;  %695 = vmatprep.mubr.msk.f32.mxu0 %vm869_vm0, %v870_v23  ;;  %694 = vmatpush3.msk.msra.mxu0 %vm436_vm5, %v229_v60 }
  0xd8   : > { %v352_v58 = vsel %vm252_vm2, %v351_v56, %v347_v57 }
  0xd9   : > { %v357_v59 = vsel %vm259_vm3, %v356_v55, %v352_v58 }
  0xda   : > { %691 = vmatmul.mubr.msk.f32.vlgmr.msra.gmra.mrb[0].mxu1 %vm261_vm4, %v357_v59 }
 0x1a8   : > { %v330_v61 = vpop.f32.mrb[0].mxu0 }
 0x1a9   : > { %v681_v62 = vpop.f32.mrb[1].mxu0  ;;  %v334_v3 = vmax.f32 %v330_v61, 0.0 }
 0x1ad   : > { %v426_v63 = vpop.f32.mrb[0].mxu1 }
 0x1ae   : > { %v430_v7 = vmax.f32 %v426_v63, 0.0  ;;  %v692_v10 = vpop.f32.mrb[1].mxu1 }
 0x1b0   : > { %v431_v11 = vadd.f32 %v430_v7, %v334_v3 }
 0x1b2   : > { %696 = vmatmul.mubr.msk.f32.vlgmr.msra.gmra.mrb[2].mxu0 %vm432_vm6, %v431_v11 }
 0x285   : > { %v506_v12 = vpop.f32.mrb[2].mxu0 }
 0x286   : > { %v651_v13 = vmul.f32 -1.442695, %v506_v12  ;;  %v697_v14 = vpop.f32.mrb[3].mxu0 }
 0x288   : > { %763 = vpow2.f32 %v651_v13 }
 0x292   : > { %v764_v15 = vpop.eup %763 }
 0x293   : > { %v513_v16 = vadd.f32 1.0, %v764_v15 }
 0x295   : > { %765 = vrcp.f32 %v513_v16 }
 0x29f   : > { %v766_v18 = vpop.eup %765 }
 0x2a0   : > { %v519_v19 = vrot.slane %v766_v18, %v518_v17 }
 0x2a2   : > { %525 = vbcast.lane.b32.xlu1 %v519_v19, 264  ;;  %521 = vbcast.lane.b32.xlu0 %v519_v19, 256 }
 0x2a6   : > { %529 = vbcast.lane.b32.xlu1 %v519_v19, 272 }
 0x2aa   : > { %533 = vbcast.lane.b32.xlu1 %v519_v19, 280 }
 0x314   : > { %v526_v20 = vpop.permute.xlu1 %525  ;;  %v522_v21 = vpop.permute.xlu0 %521 }
 0x315   : > { %v537_v22 = vmul.f32 %v526_v20, %v1024_v8  ;;  %v538_v23 = vmul.f32 %v526_v20, %v1026_v9  ;;  %v535_v24 = vmul.f32 %v522_v21, %v1012_v2  ;;  %v536_v25 = vmul.f32 %v522_v21, %v1016_v4 }
 0x317   : > { %545 = vst [vmem:[%s188_s27 + $0x10] sm:$0xff] %v537_v22  ;;  %546 = vst [vmem:[%s188_s27 + $0x18] sm:$0xff] %v538_v23 }
 0x318   : > { %543 = vst [vmem:[%s188_s27] sm:$0xff] %v535_v24  ;;  %544 = vst [vmem:[%s188_s27 + $0x8] sm:$0xff] %v536_v25  ;;  %v530_v26 = vpop.permute.xlu1 %529 }
 0x319   : > { %v539_v27 = vmul.f32 %v530_v26, %v1008_v0  ;;  %v540_v8 = vmul.f32 %v530_v26, %v1010_v1 }
 0x31b   : > { %547 = vst [vmem:[%s188_s27 + $0x20] sm:$0xff] %v539_v27  ;;  %548 = vst [vmem:[%s188_s27 + $0x28] sm:$0xff] %v540_v8 }
 0x31c   : > { %v534_v2 = vpop.permute.xlu1 %533 }
 0x31d   : > { %v541_v4 = vmul.f32 %v534_v2, %v1018_v5  ;;  %v542_v0 = vmul.f32 %v534_v2, %v1020_v6 }
 0x31f   : > { %549 = vst [vmem:[%s188_s27 + $0x30] sm:$0xff] %v541_v4  ;;  %550 = vst [vmem:[%s188_s27 + $0x38] sm:$0xff] %v542_v0 }
 0x320   : > { %810 = shalt.err (!%p807_p2)
}
 0x321   : > { %s811_s7 = scalar_lea.hbm %s1083_s10, 1024  ;;  %s815_s19 = scalar_lea.hbm %s1132_s3, 2048 }
 0x322   : > { %p812_p4 = scmp.ne.s32.totalorder %s1083_s10, %s811_s7  ;;  %p816_p9 = scmp.lt.u32.totalorder %s1083_s10, %s1132_s3 }
 0x323   : > { %p817_p1 = scmp.lt.u32.totalorder %s815_s19, %s811_s7  ;;  %p819_p6 = scmp.lt.u32.totalorder %s811_s7, %s1083_s10 }
 0x324   : > { %p813_p5 = pnand %p812_p4, %p1139_p11 }
 0x325   : > { %p818_p3 = por %p817_p1, %p816_p9 }
 0x326   : > { %p814_p7 = pneg %p813_p5 }
 0x327   : > { %p820_p12 = por %p819_p6, %p818_p3 }
 0x329   : > { %p821_p13 = pnand %p820_p12, %p814_p7 }
 0x32b   : > { %824 = shalt.err (!%p821_p13)
}
 0x32c   : > { %s872_s26 = smov 256   ;;  %s873_s27 = smov 16  }
 0x32d   : > { %712 = dma.vmem_to_hbm [thread:$0]  (%p1139_p11), %s1078_s28, 1024, %s1083_s10, %s552_s16, %s872_s26, %s872_s26, %s873_s27  }
 0x32e PF: > { %s580_s29 = sand.u32 1, %s851_s12   ;;  %p1140_p8 = scmp.ne.s32.totalorder %s1137_s25, 0 }
 0x32f   : > { %p1141_p10 = scmp.ge.s32.totalorder %s863_s15, 2  ;;  %s581_s30 = scalar_lea.sflag [#allocation4], %s580_s29 }
 0x331   : > { %p719_p0 = pnand %p1141_p10, %p1140_p8 }
 0x333   : > { %846 = dma.done.wait (!%p719_p0), %s581_s30, 1024  }
 0x334   : > { %848 = vsyncadd (!%p719_p0), %s581_s30, 4294966272  ;;  %p16_p2 = scmp.ge.s32.totalorder %s919_s18, 4   ;;  %s1142_s12 = smov %s855_s13 }
 0x335   : > { %s1143_s13 = smov %s859_s14  ;;  %s1144_s14 = smov %s931_s21 }
 0x336   : > { %s1145_s15 = smov %s919_s18  ;;  %18 = sbr.rel (!%p16_p2) target bundleno = 5 (0x5), region = 77 }
 0x33d   :  { %586 = vsyncpa [#allocation3], 1 }
 0x33e   :  { %588 = vsyncpa [#allocation3 + $0x1], 1 }
 0x33f   :  { %589 = vsyncpa [#allocation4], 1 }
 0x340   :  { %591 = vsyncpa [#allocation4 + $0x1], 1 }

</bundles_post_ra>
